<compile_context>
chip_gen: v7x
topology: tpu7x:2x2x1
jax: 0.10.0
libtpu: 0.0.40
codegen_flags: <defaults>
</compile_context>

<pallas_src>
import math
from functools import partial

import jax
import jax.numpy as jnp
from jax.experimental import pallas as pl
from jax.experimental.pallas import tpu as pltpu

NEG_SLOPE = 0.01  # PyTorch F.leaky_relu default

_MIB = 1 << 20
_VMEM_SOFT_BUDGET = 28 * _MIB   # target working-set when picking TILE_B
_VMEM_LIMIT_CAP = 48 * _MIB     # stays inside v7x's 64 MiB physical VMEM


def _leaky_relu(x):
    # max(x, a*x) == where(x > 0, x, a*x) for 0 < a < 1; one fewer VPU op/elem.
    return jnp.maximum(x, NEG_SLOPE * x)


def _combiner_kernel(x_ref, w1_ref, b1_ref, w2_ref, b2_ref, w3_ref, b3_ref,
                     o_ref, *, matmul_dtype):
    # One batch tile: x is (TILE_B, K); weights are pinned across the grid.
    x = x_ref[...].astype(matmul_dtype)

    # Layers 1 & 2 on the MXU with f32 accumulation; bias-add + leaky_relu stay
    # f32 on the VPU (v5e has no bf16 VPU path).
    h1 = jnp.dot(x, w1_ref[...].astype(matmul_dtype),
                 preferred_element_type=jnp.float32)
    h1 = _leaky_relu(h1 + b1_ref[...])

    h2 = jnp.dot(h1.astype(matmul_dtype), w2_ref[...].astype(matmul_dtype),
                 preferred_element_type=jnp.float32)
    h2 = _leaky_relu(h2 + b2_ref[...])

    # Layer 3 (out_features = 1): elementwise multiply + lane reduction instead
    # of an N=1 matmul that would light up a single MXU output lane.
    # TODO(synk): if a bundle dump shows the XLU as the binding slot at small
    # input_size, switch this to an MXU dot into a (TILE_B, 1) scratch.
    y = jnp.sum(h2 * w3_ref[...], axis=-1)[None, :] + b3_ref[0, 0]  # (1, TILE_B)

    # Lane-dense store: (1, TILE_B) with TILE_B a multiple of 128 -> unmasked vst.
    o_ref[...] = _leaky_relu(y).astype(o_ref.dtype)


def _vmem_estimate(tile_b, K, H1, H2, x_itemsize, w_itemsize):
    """Rough resident-VMEM bytes for one pipelined step."""
    weights = (K * H1 + H1 * H2) * w_itemsize + (H1 + 2 * H2 + 1) * 4  # single-buffered
    x_tiles = 2 * tile_b * K * x_itemsize          # double-buffered x tile
    out_row = 2 * 8 * tile_b * 4                   # (1,TILE_B) row padded to 8 sublanes, x2
    transients = tile_b * (H1 + H2) * 4            # f32 h1 / h2
    if w_itemsize < 4:
        transients += tile_b * (K + H1) * w_itemsize  # bf16 MXU copies of x / h1
    return weights + x_tiles + out_row + transients


def _choose_tile_b(B, K, x_itemsize, w_itemsize, H1, H2, requested=None):
    B128 = pl.cdiv(B, 128) * 128
    if requested is None:
        # Aim for an x tile of ~2 MiB so per-step overhead is amortized at small K.
        rows = (2 * _MIB) // max(1, K * x_itemsize)
        lo = 512
    else:
        rows = int(requested)
        lo = 128
    tile = max(lo, min(8192, (rows // 128) * 128))
    tile = min(tile, B128)
    if B128 >= 256:
        # Keep at least 2 grid steps so both v7x TensorCores get work.
        tile = min(tile, max(128, (B128 // 2 // 128) * 128))
    tile = max(128, tile)
    while tile > 128 and _vmem_estimate(tile, K, H1, H2, x_itemsize, w_itemsize) > _VMEM_SOFT_BUDGET:
        tile -= 128
    if B % 128 == 0:
        # Prefer a tile that divides B exactly -> no jnp.pad HBM round-trip.
        for cand in range(tile, 127, -128):
            if B % cand == 0:
                return cand
    return tile


def combiner_forward(x, params, *, tile_b=None, matmul_dtype=jnp.bfloat16):
    """x: (B, input_size). Returns (B, 1) float32.

    Default is bf16 MXU operands with f32 accumulation (fast on every TPU
    generation and halves weight DMA/VMEM); this intentionally diverges from
    PyTorch f32 numerics by ~bf16 rounding. Pass matmul_dtype=jnp.float32 for
    bit-exact parity with the reference module.
    """
    w1, b1, w2, b2, w3, b3 = (params[k] for k in ("w1", "b1", "w2", "b2", "w3", "b3"))
    B, K = x.shape
    H1 = w1.shape[1]
    H2 = w2.shape[1]

    # Cast the resident matmul weights once here (halves their HBM->VMEM bytes
    # for bf16). Biases / fc3 row stay f32 for the VPU/XLU epilogue. x is NOT
    # cast in the wrapper (that would be an extra HBM pass); the kernel casts
    # per tile, and bf16 x is accepted as-is.
    if w1.dtype != matmul_dtype:
        w1 = w1.astype(matmul_dtype)
    if w2.dtype != matmul_dtype:
        w2 = w2.astype(matmul_dtype)

    x_itemsize = jnp.dtype(x.dtype).itemsize
    w_itemsize = jnp.dtype(matmul_dtype).itemsize
    TILE_B = _choose_tile_b(B, K, x_itemsize, w_itemsize, H1, H2, tile_b)

    B_pad = pl.cdiv(B, TILE_B) * TILE_B
    if B_pad != B:
        # TODO(synk): for very large ragged B, run the aligned prefix through the
        # kernel and the small remainder in plain XLA instead of materializing a
        # padded copy of x.
        x = jnp.pad(x, ((0, B_pad - B), (0, 0)))
    grid = (B_pad // TILE_B,)

    est = _vmem_estimate(TILE_B, K, H1, H2, x_itemsize, w_itemsize)
    vmem_limit = int(min(_VMEM_LIMIT_CAP, max(32 * _MIB, est + 12 * _MIB)))
    # TODO(synk): for input_size large enough that single-buffered weights exceed
    # the VMEM cap (f32 K >~ 1.5k on v7x), add an H1 grid axis that streams w1
    # columns / w2 rows with a pl.when-initialized f32 h2 accumulator.

    def pinned(a):
        # Constant index_map -> the re-DMA per step is skipped; Buffered(1) also
        # drops the dead second buffer so pinned weights take half the VMEM.
        return pl.BlockSpec(a.shape, lambda i: (0,) * a.ndim,
                            pipeline_mode=pl.Buffered(1))

    out = pl.pallas_call(
        partial(_combiner_kernel, matmul_dtype=matmul_dtype),
        out_shape=jax.ShapeDtypeStruct((1, B_pad), jnp.float32),
        grid=grid,
        in_specs=[
            pl.BlockSpec((TILE_B, K), lambda i: (i, 0)),          # batch-tiled x
            pinned(w1), pinned(b1),
            pinned(w2), pinned(b2),
            pinned(w3),
            pl.BlockSpec(memory_space=pltpu.MemorySpace.SMEM),     # scalar b3
        ],
        out_specs=pl.BlockSpec((1, TILE_B), lambda i: (0, i)),     # lane-dense row
        compiler_params=pltpu.CompilerParams(
            dimension_semantics=("parallel",),                     # megacore on v7x
            vmem_limit_bytes=vmem_limit),
    )(x, w1, b1, w2, b2, w3, b3)

    return out[0, :B].reshape(B, 1)


def init_params(key, input_size):
    """Deterministic init mirroring the PyTorch module's shapes.

    fc1: input_size -> 2*input_size           (stored as (in, out))
    fc2: 2*input_size -> ceil(0.5*input_size) (stored as (in, out))
    fc3: ceil(0.5*input_size) -> 1            (stored as (1, in) PyTorch layout)
    Weights ~ U(-0.1, 0.1) (as in the module); biases use PyTorch's default
    U(-1/sqrt(fan_in), 1/sqrt(fan_in)).
    """
    h1 = input_size * 2
    h2 = math.ceil(input_size * 0.5)
    ks = jax.random.split(key, 6)

    def w_t(k, fan_in, fan_out):      # transposed (in, out) for the MXU layers
        return jax.random.uniform(k, (fan_in, fan_out), jnp.float32, -0.1, 0.1)

    def b(k, fan_in, fan_out):
        bound = 1.0 / math.sqrt(fan_in)
        return jax.random.uniform(k, (1, fan_out), jnp.float32, -bound, bound)

    return {
        "w1": w_t(ks[0], input_size, h1), "b1": b(ks[1], input_size, h1),
        "w2": w_t(ks[2], h1, h2),         "b2": b(ks[3], h1, h2),
        # fc3 kept as (1, h2): it feeds the lane reduction, not a matmul.
        "w3": jax.random.uniform(ks[4], (1, h2), jnp.float32, -0.1, 0.1),
        "b3": b(ks[5], h2, 1),
    }


def reference_forward(x, params):
    h = _leaky_relu(x @ params["w1"] + params["b1"])
    h = _leaky_relu(h @ params["w2"] + params["b2"])
    return _leaky_relu(h @ params["w3"].T + params["b3"])


if __name__ == "__main__":
    key = jax.random.PRNGKey(0)
    k_x, k_p, k_x2, k_p2 = jax.random.split(key, 4)

    batch, input_size = 8, 32
    x = jax.random.normal(k_x, (batch, input_size), jnp.float32)
    params = init_params(k_p, input_size)
    y_ref = reference_forward(x, params)

    # Default fast path: bf16 MXU operands, f32 accumulate + f32 epilogue.
    y = combiner_forward(x, params)
    jax.block_until_ready(y)
    assert y.shape == (batch, 1)
    assert jnp.allclose(y, y_ref, atol=3e-2, rtol=3e-2)

    # Opt-in bit-exact path: f32 end to end (matches PyTorch f32 numerics).
    y_f32 = combiner_forward(x, params, matmul_dtype=jnp.float32)
    jax.block_until_ready(y_f32)
    assert y_f32.shape == (batch, 1)
    assert jnp.allclose(y_f32, y_ref, atol=1e-4, rtol=1e-4)

    # Multi-step grid, B divisible by the chosen tile (no padding copy).
    batch2, input_size2 = 384, 64
    x2 = jax.random.normal(k_x2, (batch2, input_size2), jnp.float32)
    params2 = init_params(k_p2, input_size2)
    y2 = combiner_forward(x2, params2, matmul_dtype=jnp.float32)
    jax.block_until_ready(y2)
    assert y2.shape == (batch2, 1)
    assert jnp.allclose(y2, reference_forward(x2, params2), atol=1e-4, rtol=1e-4)

    print("KERNEL_OK")
</pallas_src>

<mosaic_0001>
module attributes {stable_mosaic.version = 11 : i64} {
  func.func @_combiner_kernel(%arg0: i32, %arg1: memref<128x32xf32, #tpu.memory_space<vmem>>, %arg2: memref<32x64xbf16, #tpu.memory_space<vmem>>, %arg3: memref<1x64xf32, #tpu.memory_space<vmem>>, %arg4: memref<64x16xbf16, #tpu.memory_space<vmem>>, %arg5: memref<1x16xf32, #tpu.memory_space<vmem>>, %arg6: memref<1x16xf32, #tpu.memory_space<vmem>>, %arg7: memref<1x1xf32, #tpu.memory_space<smem>>, %arg8: memref<1x128xf32, #tpu.memory_space<vmem>>) attributes {dimension_semantics = [#tpu.dimension_semantics<parallel>], iteration_bounds = array<i64: 1>, scalar_prefetch = 0 : i64, scratch_operands = 0 : i64, tpu.core_type = #tpu.core_type<tc>, window_params = [{transform_indices = @transform_0, window_bounds = array<i64: 128, 32>}, {pipeline_mode = #tpu.pipeline_mode<synchronous>, transform_indices = @transform_1, window_bounds = array<i64: 32, 64>}, {pipeline_mode = #tpu.pipeline_mode<synchronous>, transform_indices = @transform_2, window_bounds = array<i64: 1, 64>}, {pipeline_mode = #tpu.pipeline_mode<synchronous>, transform_indices = @transform_3, window_bounds = array<i64: 64, 16>}, {pipeline_mode = #tpu.pipeline_mode<synchronous>, transform_indices = @transform_4, window_bounds = array<i64: 1, 16>}, {pipeline_mode = #tpu.pipeline_mode<synchronous>, transform_indices = @transform_5, window_bounds = array<i64: 1, 16>}, {transform_indices = @transform_6, window_bounds = array<i64: 1, 1>}, {transform_indices = @transform_7, window_bounds = array<i64: 1, 128>}]} {
    %c0 = arith.constant 0 : index
    %c0_0 = arith.constant 0 : index
    %0 = vector.load %arg1[%c0, %c0_0] : memref<128x32xf32, #tpu.memory_space<vmem>>, vector<128x32xf32>
    %1 = arith.truncf %0 : vector<128x32xf32> to vector<128x32xbf16>
    %c0_1 = arith.constant 0 : index
    %c0_2 = arith.constant 0 : index
    %2 = vector.load %arg2[%c0_1, %c0_2] : memref<32x64xbf16, #tpu.memory_space<vmem>>, vector<32x64xbf16>
    %cst = arith.constant dense<0.000000e+00> : vector<128x64xf32>
    %3 = tpu.matmul %1, %2, %cst {dimension_numbers = #tpu.dot_dimension_numbers<[1], [0], [0], [1], [0, 0, 1, 1], [], []>} : vector<128x32xbf16>, vector<32x64xbf16>, vector<128x64xf32> -> vector<128x64xf32>
    %c0_3 = arith.constant 0 : index
    %c0_4 = arith.constant 0 : index
    %4 = vector.load %arg3[%c0_3, %c0_4] : memref<1x64xf32, #tpu.memory_space<vmem>>, vector<1x64xf32>
    %5 = vector.broadcast %4 : vector<1x64xf32> to vector<128x64xf32>
    %6 = arith.addf %3, %5 : vector<128x64xf32>
    %cst_5 = arith.constant 0.00999999977 : f32
    %7 = vector.broadcast %cst_5 : f32 to vector<128x64xf32>
    %8 = arith.mulf %7, %6 : vector<128x64xf32>
    %9 = arith.maximumf %6, %8 : vector<128x64xf32>
    %10 = arith.truncf %9 : vector<128x64xf32> to vector<128x64xbf16>
    %c0_6 = arith.constant 0 : index
    %c0_7 = arith.constant 0 : index
    %11 = vector.load %arg4[%c0_6, %c0_7] : memref<64x16xbf16, #tpu.memory_space<vmem>>, vector<64x16xbf16>
    %cst_8 = arith.constant dense<0.000000e+00> : vector<128x16xf32>
    %12 = tpu.matmul %10, %11, %cst_8 {dimension_numbers = #tpu.dot_dimension_numbers<[1], [0], [0], [1], [0, 0, 1, 1], [], []>} : vector<128x64xbf16>, vector<64x16xbf16>, vector<128x16xf32> -> vector<128x16xf32>
    %c0_9 = arith.constant 0 : index
    %c0_10 = arith.constant 0 : index
    %13 = vector.load %arg5[%c0_9, %c0_10] : memref<1x16xf32, #tpu.memory_space<vmem>>, vector<1x16xf32>
    %14 = vector.broadcast %13 : vector<1x16xf32> to vector<128x16xf32>
    %15 = arith.addf %12, %14 : vector<128x16xf32>
    %cst_11 = arith.constant 0.00999999977 : f32
    %16 = vector.broadcast %cst_11 : f32 to vector<128x16xf32>
    %17 = arith.mulf %16, %15 : vector<128x16xf32>
    %18 = arith.maximumf %15, %17 : vector<128x16xf32>
    %c0_12 = arith.constant 0 : index
    %c0_13 = arith.constant 0 : index
    %19 = vector.load %arg6[%c0_12, %c0_13] : memref<1x16xf32, #tpu.memory_space<vmem>>, vector<1x16xf32>
    %20 = vector.broadcast %19 : vector<1x16xf32> to vector<128x16xf32>
    %21 = arith.mulf %18, %20 : vector<128x16xf32>
    %cst_14 = arith.constant dense<0.000000e+00> : vector<128xf32>
    %22 = vector.multi_reduction <add>, %21, %cst_14 [1] : vector<128x16xf32> to vector<128xf32>
    %23 = vector.shape_cast %22 : vector<128xf32> to vector<1x128xf32>
    %c0_15 = arith.constant 0 : index
    %c0_16 = arith.constant 0 : index
    %24 = memref.load %arg7[%c0_15, %c0_16] : memref<1x1xf32, #tpu.memory_space<smem>>
    %25 = vector.broadcast %24 : f32 to vector<1x128xf32>
    %26 = arith.addf %23, %25 : vector<1x128xf32>
    %cst_17 = arith.constant 0.00999999977 : f32
    %27 = vector.broadcast %cst_17 : f32 to vector<1x128xf32>
    %28 = arith.mulf %27, %26 : vector<1x128xf32>
    %29 = arith.maximumf %26, %28 : vector<1x128xf32>
    %c0_18 = arith.constant 0 : index
    %c0_19 = arith.constant 0 : index
    %30 = vector.load %arg8[%c0_18, %c0_19] : memref<1x128xf32, #tpu.memory_space<vmem>>, vector<1x128xf32>
    tpu.vector_store %arg8[%c0_18, %c0_19], %29 {strides = array<i32>} : memref<1x128xf32, #tpu.memory_space<vmem>>, vector<1x128xf32>,
    return
  }
  func.func @transform_0(%arg0: i32) -> (i32, i32) {
    %c0_i32 = arith.constant 0 : i32
    %c0_i32_0 = arith.constant 0 : i32
    return %arg0, %c0_i32 : i32, i32
  }
  func.func @transform_1(%arg0: i32) -> (i32, i32) {
    %c0_i32 = arith.constant 0 : i32
    %c0_i32_0 = arith.constant 0 : i32
    %c0_i32_1 = arith.constant 0 : i32
    return %c0_i32, %c0_i32_0 : i32, i32
  }
  func.func @transform_2(%arg0: i32) -> (i32, i32) {
    %c0_i32 = arith.constant 0 : i32
    %c0_i32_0 = arith.constant 0 : i32
    %c0_i32_1 = arith.constant 0 : i32
    return %c0_i32, %c0_i32_0 : i32, i32
  }
  func.func @transform_3(%arg0: i32) -> (i32, i32) {
    %c0_i32 = arith.constant 0 : i32
    %c0_i32_0 = arith.constant 0 : i32
    %c0_i32_1 = arith.constant 0 : i32
    return %c0_i32, %c0_i32_0 : i32, i32
  }
  func.func @transform_4(%arg0: i32) -> (i32, i32) {
    %c0_i32 = arith.constant 0 : i32
    %c0_i32_0 = arith.constant 0 : i32
    %c0_i32_1 = arith.constant 0 : i32
    return %c0_i32, %c0_i32_0 : i32, i32
  }
  func.func @transform_5(%arg0: i32) -> (i32, i32) {
    %c0_i32 = arith.constant 0 : i32
    %c0_i32_0 = arith.constant 0 : i32
    %c0_i32_1 = arith.constant 0 : i32
    return %c0_i32, %c0_i32_0 : i32, i32
  }
  func.func @transform_6(%arg0: i32) -> (i32, i32) {
    %c0_i32 = arith.constant 0 : i32
    %c0_i32_0 = arith.constant 0 : i32
    %c0_i32_1 = arith.constant 0 : i32
    return %c0_i32, %c0_i32_0 : i32, i32
  }
  func.func @transform_7(%arg0: i32) -> (i32, i32) {
    %c0_i32 = arith.constant 0 : i32
    %c0_i32_0 = arith.constant 0 : i32
    return %c0_i32, %arg0 : i32, i32
  }
}

</mosaic_0001>

<bundles_post_ra>
// kernel: tpu_custom_call.1
= control target key start
LH: loop header
LB: loop body
LE: loop exit
PB: predicated region body
PF: predicated region fallthrough
CT: control target
= control target key end

     0   :  { %vm76_vm0 = vcmask 261120   ;;  %s1115_s0 = inlined_call_operand.vmem [shape: f32[128,32], index: 0, kind: input, shape index: {}]   ;;  %s1116_s1 = inlined_call_operand.vmem [shape: bf16[32,64], index: 1, kind: input, shape index: {}]   ;;  %s1117_s2 = inlined_call_operand.vmem [shape: f32[1,64], index: 2, kind: input, shape index: {}]   ;;  %s1118_s3 = inlined_call_operand.vmem [shape: bf16[64,16], index: 3, kind: input, shape index: {}]   ;;  %s1119_s4 = inlined_call_operand.vmem [shape: f32[1,16], index: 4, kind: input, shape index: {}]   ;;  %s1120_s5 = inlined_call_operand.vmem [shape: f32[1,16], index: 5, kind: input, shape index: {}]   ;;  %s1121_s6 = inlined_call_operand.<no memory space> [shape: f32[1,1], index: 6, kind: input, shape index: {}]   ;;  %s1122_s7 = inlined_call_operand.hbm [shape: f32[1,128], index: 7, kind: output, shape index: {}]  }
   0x1   :  { %v788_v0 = vld [vmem:[%s1116_s1] sm:$0xff]   ;;  %v789_v1 = vld [vmem:[%s1116_s1 + $0x8] sm:$0xff]   ;;  %v31_v5 = vld [vmem:[%s1115_s0 + $0x10] sm:$0xff] }
   0x2   :  { %743 = vmatprep.subr.bf16.mxu0 %v788_v0  ;;  %v29_v2 = vld [vmem:[%s1115_s0] sm:$0xff]  ;;  %v30_v3 = vld [vmem:[%s1115_s0 + $0x8] sm:$0xff]  ;;  %v32_v6 = vld [vmem:[%s1115_s0 + $0x18] sm:$0xff] }
   0x3   :  { %744 = vmatpush3.bf16.msra.mxu0 %v788_v0  ;;  %v45_v4 = vpack.c.bf16 %v30_v3, %v29_v2  ;;  %v33_v7 = vld [vmem:[%s1115_s0 + $0x20] sm:$0xff]  ;;  %v34_v8 = vld [vmem:[%s1115_s0 + $0x28] sm:$0xff]  ;;  %v46_v9 = vpack.c.bf16 %v32_v6, %v31_v5 }
   0x4   :  { %745 = vmatprep.subr.bf16.mxu0 %v789_v1  ;;  %v47_v10 = vpack.c.bf16 %v34_v8, %v33_v7  ;;  %v790_v11 = vld [vmem:[%s1118_s3] sm:$0xff]  }
   0x5   :  { %747 = vmatprep.mubr.msk.bf16.mxu0 %vm76_vm0, %v45_v4  ;;  %763 = vmatprep.subr.bf16.mxu1 %v790_v11 }
   0x7   :  { %746 = vmatpush3.bf16.msra.mxu0 %v789_v1 }
   0xa   :  { %748 = vmatmul.mubr.msk.bf16.vlgmr.msra.gmra.mrb[0].mxu0 %vm76_vm0, %v46_v9 }
   0xb   :  { %13 = vsyncpa [#allocation4], 0  ;;  %751 = vmatprep.mubr.msk.bf16.mxu0 %vm76_vm0, %v47_v10  ;;  %v35_v12 = vld [vmem:[%s1115_s0 + $0x30] sm:$0xff]  ;;  %v36_v13 = vld [vmem:[%s1115_s0 + $0x38] sm:$0xff]  ;;  %764 = vmatpush3.bf16.msra.mxu1 %v790_v11  ;;  %vm277_vm1 = vcmask 523264   ;;  %vm454_vm2 = vcmask 130048  }
   0xc   :  { %v37_v14 = vld [vmem:[%s1115_s0 + $0x40] sm:$0xff]  ;;  %v38_v15 = vld [vmem:[%s1115_s0 + $0x48] sm:$0xff]  ;;  %v48_v16 = vpack.c.bf16 %v36_v13, %v35_v12  ;;  %v39_v18 = vld [vmem:[%s1115_s0 + $0x50] sm:$0xff]  ;;  %vm580_vm3 = vcmask 130112   ;;  %vm587_vm4 = vcmask 195712   ;;  %vm594_vm5 = vcmask 261312  }
   0xd   :  { %v49_v17 = vpack.c.bf16 %v38_v15, %v37_v14  ;;  %v40_v19 = vld [vmem:[%s1115_s0 + $0x58] sm:$0xff]  ;;  %v41_v20 = vld [vmem:[%s1115_s0 + $0x60] sm:$0xff]  ;;  %v42_v21 = vld [vmem:[%s1115_s0 + $0x68] sm:$0xff]  ;;  %vm601_vm6 = vcmask 326912   ;;  %vm608_vm7 = vcmask 392512   ;;  %vm615_vm8 = vcmask 458112  }
   0xe   :  { %v50_v22 = vpack.c.bf16 %v40_v19, %v39_v18  ;;  %v51_v23 = vpack.c.bf16 %v42_v21, %v41_v20  ;;  %v43_v24 = vld [vmem:[%s1115_s0 + $0x70] sm:$0xff]  ;;  %v44_v25 = vld [vmem:[%s1115_s0 + $0x78] sm:$0xff]  ;;  %v791_v27 = vld [vmem:[%s1118_s3 + $0x8] sm:$0xff]   ;;  %vm622_vm9 = vcmask 523712   ;;  %vm629_vm10 = vcmask 589312  }
   0xf   :  { %v52_v26 = vpack.c.bf16 %v44_v25, %v43_v24  ;;  %765 = vmatprep.subr.bf16.mxu1 %v791_v27  ;;  %v792_v28 = vld [vmem:[%s1118_s3 + $0x10] sm:$0xff]   ;;  %v793_v29 = vld [vmem:[%s1118_s3 + $0x18] sm:$0xff]   ;;  %v936_v30 = vld [vmem:[%s1117_s2] ss:$0 sm:$0xff]  ;;  %vm636_vm11 = vcmask 654912   ;;  %vm643_vm12 = vcmask 720512  }
  0x10   :  { %766 = vmatpush3.bf16.msra.mxu1 %v791_v27  ;;  %vm650_vm13 = vcmask 786112   ;;  %vm657_vm14 = vcmask 851712   ;;  %vm664_vm15 = vcmask 917312  }
  0x11   :  { %767 = vmatprep.subr.bf16.mxu1 %v792_v28 }
  0x12   :  { %752 = vmatmul.mubr.msk.bf16.gmra.mrb[4].mxu0 %vm76_vm0, %v48_v16 }
  0x13   :  { %755 = vmatprep.mubr.msk.bf16.mxu0 %vm76_vm0, %v49_v17 }
  0x14   :  { %768 = vmatpush3.bf16.msra.mxu1 %v792_v28 }
  0x15   :  { %769 = vmatprep.subr.bf16.mxu1 %v793_v29 }
  0x18   :  { %770 = vmatpush3.bf16.msra.mxu1 %v793_v29 }
  0x1a   :  { %756 = vmatmul.mubr.msk.bf16.gmra.mrb[8].mxu0 %vm76_vm0, %v50_v22 }
  0x1b   :  { %759 = vmatprep.mubr.msk.bf16.mxu0 %vm76_vm0, %v51_v23 }
  0x22   :  { %760 = vmatmul.mubr.msk.bf16.gmra.mrb[12].mxu0 %vm76_vm0, %v52_v26  ;;  %vm671_vm0 = vcmask 982912  }
  0xdd   :  { %v749_v31 = vpop.f32.mrb[0].mxu0 }
  0xde   :  { %v144_v32 = vadd.f32 %v749_v31, %v936_v30  ;;  %v135_v33 = vpop.f32.mrb[1].mxu0 }
  0xdf   :  { %v136_v34 = vadd.f32 %v936_v30, %v135_v33  ;;  %v750_v35 = vpop.f32.mrb[2].mxu0 }
  0xe0   :  { %v200_v36 = vmul.f32 0.01, %v144_v32  ;;  %v147_v37 = vadd.f32 %v750_v35, %v936_v30  ;;  %v138_v38 = vpop.f32.mrb[3].mxu0 }
  0xe1   :  { %v198_v39 = vmul.f32 0.01, %v136_v34  ;;  %v139_v40 = vadd.f32 %v936_v30, %v138_v38 }
  0xe2   :  { %v201_v41 = vmul.f32 0.01, %v147_v37  ;;  %v216_v43 = vmax.f32 %v144_v32, %v200_v36 }
  0xe3   :  { %v199_v42 = vmul.f32 0.01, %v139_v40  ;;  %v214_v45 = vmax.f32 %v136_v34, %v198_v39 }
  0xe4   :  { %v217_v44 = vmax.f32 %v147_v37, %v201_v41 }
  0xe5   :  { %v215_v46 = vmax.f32 %v139_v40, %v199_v42  ;;  %v753_v47 = vpop.f32.mrb[4].mxu0 }
  0xe6   :  { %v231_v48 = vpack.c.bf16 %v217_v44, %v216_v43  ;;  %v160_v49 = vadd.f32 %v753_v47, %v936_v30  ;;  %v151_v50 = vpop.f32.mrb[5].mxu0 }
  0xe7   :  { %v152_v51 = vadd.f32 %v936_v30, %v151_v50  ;;  %v754_v52 = vpop.f32.mrb[6].mxu0  ;;  %v230_v53 = vpack.c.bf16 %v215_v46, %v214_v45  ;;  %v974_v50 = vld [vmem:[%s1120_s5] ss:$0 sm:$0xff] }
  0xe8   :  { %v204_v54 = vmul.f32 0.01, %v160_v49  ;;  %v163_v55 = vadd.f32 %v754_v52, %v936_v30  ;;  %v154_v56 = vpop.f32.mrb[7].mxu0 }
  0xe9   :  { %v202_v57 = vmul.f32 0.01, %v152_v51  ;;  %v155_v58 = vadd.f32 %v936_v30, %v154_v56  ;;  %771 = vmatprep.mubr.msk.bf16.mxu1 %vm277_vm1, %v230_v53 }
  0xea   :  { %v205_v59 = vmul.f32 0.01, %v163_v55  ;;  %772 = vmatmul.mubr.msk.bf16.vlgmr.msra.gmra.mrb[0].mxu1 %vm277_vm1, %v231_v48  ;;  %v220_v61 = vmax.f32 %v160_v49, %v204_v54 }
  0xeb   :  { %v203_v60 = vmul.f32 0.01, %v155_v58  ;;  %v218_v63 = vmax.f32 %v152_v51, %v202_v57 }
  0xec   :  { %v221_v62 = vmax.f32 %v163_v55, %v205_v59 }
  0xed   :  { %v219_v0 = vmax.f32 %v155_v58, %v203_v60  ;;  %v757_v1 = vpop.f32.mrb[8].mxu0 }
  0xee   :  { %v233_v2 = vpack.c.bf16 %v221_v62, %v220_v61  ;;  %v176_v3 = vadd.f32 %v757_v1, %v936_v30  ;;  %v167_v4 = vpop.f32.mrb[9].mxu0 }
  0xef   :  { %v232_v5 = vpack.c.bf16 %v219_v0, %v218_v63  ;;  %v168_v6 = vadd.f32 %v936_v30, %v167_v4  ;;  %v758_v7 = vpop.f32.mrb[10].mxu0 }
  0xf0   :  { %v208_v8 = vmul.f32 0.01, %v176_v3  ;;  %v179_v9 = vadd.f32 %v758_v7, %v936_v30  ;;  %v170_v10 = vpop.f32.mrb[11].mxu0 }
  0xf1   :  { %v206_v11 = vmul.f32 0.01, %v168_v6  ;;  %v171_v12 = vadd.f32 %v936_v30, %v170_v10  ;;  %775 = vmatprep.mubr.msk.bf16.mxu1 %vm277_vm1, %v232_v5 }
  0xf2   :  { %v209_v13 = vmul.f32 0.01, %v179_v9  ;;  %776 = vmatmul.mubr.msk.bf16.gmra.mrb[4].mxu1 %vm277_vm1, %v233_v2  ;;  %v224_v15 = vmax.f32 %v176_v3, %v208_v8 }
  0xf3   :  { %v207_v14 = vmul.f32 0.01, %v171_v12  ;;  %v222_v17 = vmax.f32 %v168_v6, %v206_v11 }
  0xf4   :  { %v225_v16 = vmax.f32 %v179_v9, %v209_v13 }
  0xf5   :  { %v223_v18 = vmax.f32 %v171_v12, %v207_v14  ;;  %v761_v19 = vpop.f32.mrb[12].mxu0 }
  0xf6   :  { %v235_v20 = vpack.c.bf16 %v225_v16, %v224_v15  ;;  %v192_v21 = vadd.f32 %v761_v19, %v936_v30  ;;  %v183_v22 = vpop.f32.mrb[13].mxu0 }
  0xf7   :  { %v234_v23 = vpack.c.bf16 %v223_v18, %v222_v17  ;;  %v184_v24 = vadd.f32 %v936_v30, %v183_v22  ;;  %v762_v25 = vpop.f32.mrb[14].mxu0 }
  0xf8   :  { %v212_v26 = vmul.f32 0.01, %v192_v21  ;;  %v195_v27 = vadd.f32 %v762_v25, %v936_v30  ;;  %v186_v28 = vpop.f32.mrb[15].mxu0 }
  0xf9   :  { %v210_v29 = vmul.f32 0.01, %v184_v24  ;;  %v187_v31 = vadd.f32 %v936_v30, %v186_v28  ;;  %779 = vmatprep.mubr.msk.bf16.mxu1 %vm277_vm1, %v234_v23  ;;  %v965_v30 = vld [vmem:[%s1119_s4] ss:$0 sm:$0xff] }
  0xfa   :  { %v213_v32 = vmul.f32 0.01, %v195_v27  ;;  %780 = vmatmul.mubr.msk.bf16.gmra.mrb[8].mxu1 %vm277_vm1, %v235_v20  ;;  %v228_v34 = vmax.f32 %v192_v21, %v212_v26 }
  0xfb   :  { %v211_v33 = vmul.f32 0.01, %v187_v31  ;;  %v226_v36 = vmax.f32 %v184_v24, %v210_v29 }
  0xfc   :  { %v229_v35 = vmax.f32 %v195_v27, %v213_v32 }
  0xfd   :  { %v227_v37 = vmax.f32 %v187_v31, %v211_v33 }
  0xfe   :  { %v237_v38 = vpack.c.bf16 %v229_v35, %v228_v34 }
  0xff   :  { %v236_v39 = vpack.c.bf16 %v227_v37, %v226_v36 }
 0x101   :  { %783 = vmatprep.mubr.msk.bf16.mxu1 %vm277_vm1, %v236_v39 }
 0x102   :  { %784 = vmatmul.mubr.msk.bf16.gmra.mrb[12].mxu1 %vm277_vm1, %v237_v38  ;;  %vm678_vm1 = vcmask 1048512  }
 0x1bd   :  { %v773_v40 = vpop.f32.mrb[0].mxu1 }
 0x1be   :  { %v345_v41 = vadd.f32 %v773_v40, %v965_v30  ;;  %v336_v42 = vpop.f32.mrb[1].mxu1 }
 0x1bf   :  { %v337_v43 = vadd.f32 %v965_v30, %v336_v42  ;;  %v774_v44 = vpop.f32.mrb[2].mxu1 }
 0x1c0   :  { %v401_v45 = vmul.f32 0.01, %v345_v41  ;;  %v348_v46 = vadd.f32 %v774_v44, %v965_v30  ;;  %v339_v47 = vpop.f32.mrb[3].mxu1 }
 0x1c1   :  { %v399_v48 = vmul.f32 0.01, %v337_v43  ;;  %v340_v49 = vadd.f32 %v965_v30, %v339_v47 }
 0x1c2   :  { %v417_v51 = vmax.f32 %v345_v41, %v401_v45  ;;  %v402_v52 = vmul.f32 0.01, %v348_v46 }
 0x1c3   :  { %v415_v53 = vmax.f32 %v337_v43, %v399_v48  ;;  %v400_v54 = vmul.f32 0.01, %v340_v49 }
 0x1c4   :  { %v418_v55 = vmax.f32 %v348_v46, %v402_v52  ;;  %v440_v56 = vmul.f32 %v974_v50, %v417_v51 }
 0x1c5   :  { %v416_v57 = vmax.f32 %v340_v49, %v400_v54  ;;  %v777_v58 = vpop.f32.mrb[4].mxu1  ;;  %v438_v59 = vmul.f32 %v974_v50, %v415_v53 }
 0x1c6   :  { %v361_v60 = vadd.f32 %v777_v58, %v965_v30  ;;  %v352_v61 = vpop.f32.mrb[5].mxu1  ;;  %v461_v62 = vsel %vm454_vm2, %v440_v56, 0.0  ;;  %v441_v63 = vmul.f32 %v974_v50, %v418_v55 }
 0x1c7   :  { %v353_v0 = vadd.f32 %v965_v30, %v352_v61  ;;  %462 = vadd.xlane.f32.xlu1 %v461_v62  ;;  %v778_v1 = vpop.f32.mrb[6].mxu1  ;;  %v455_v2 = vsel %vm454_vm2, %v438_v59, 0.0  ;;  %v439_v3 = vmul.f32 %v974_v50, %v416_v57 }
 0x1c8   :  { %v405_v4 = vmul.f32 0.01, %v361_v60  ;;  %v364_v5 = vadd.f32 %v778_v1, %v965_v30  ;;  %v355_v6 = vpop.f32.mrb[7].mxu1  ;;  %456 = vadd.xlane.f32.xlu0 %v455_v2  ;;  %v464_v11 = vsel %vm454_vm2, %v441_v63, 0.0 }
 0x1c9   :  { %v403_v7 = vmul.f32 0.01, %v353_v0  ;;  %v356_v8 = vadd.f32 %v965_v30, %v355_v6  ;;  %v458_v14 = vsel %vm454_vm2, %v439_v3, 0.0 }
 0x1ca   :  { %v421_v9 = vmax.f32 %v361_v60, %v405_v4  ;;  %v406_v10 = vmul.f32 0.01, %v364_v5 }
 0x1cb   :  { %v419_v12 = vmax.f32 %v353_v0, %v403_v7  ;;  %v404_v13 = vmul.f32 0.01, %v356_v8  ;;  %465 = vadd.xlane.f32.xlu1 %v464_v11  ;;  %v1023_v11 = vstv %s1121_s6  ;;  %s818_s6 = smov [#allocation3]  }
 0x1cc   :  { %v422_v15 = vmax.f32 %v364_v5, %v406_v10  ;;  %459 = vadd.xlane.f32.xlu0 %v458_v14  ;;  %v444_v16 = vmul.f32 %v974_v50, %v421_v9  ;;  %v569_v10 = vlaneseq  ;;  %s688_s23 = sshll.u32 %s818_s6, 4  ;;  %s689_s23 = int_to_ptr.vmem [resolvable:$true] %s688_s23 }
 0x1cd   :  { %v420_v17 = vmax.f32 %v356_v8, %v404_v13  ;;  %v781_v18 = vpop.f32.mrb[8].mxu1  ;;  %v442_v25 = vmul.f32 %v974_v50, %v419_v12  ;;  %s794_s24 = scalar_lea.vmem %s689_s23, 16  ;;  %s798_s25 = scalar_lea.vmem %s689_s23, 32 }
 0x1ce   :  { %v377_v19 = vadd.f32 %v781_v18, %v965_v30  ;;  %v368_v20 = vpop.f32.mrb[9].mxu1  ;;  %v473_v21 = vsel %vm454_vm2, %v444_v16, 0.0  ;;  %v445_v22 = vmul.f32 %v974_v50, %v422_v15  ;;  %v1025_v13 = vand.u32 127, %v569_v10  ;;  %p795_p0 = scmp.ne.s32.totalorder %s689_s23, %s794_s24  ;;  %p799_p1 = scmp.lt.s32.totalorder %s689_s23, %s689_s23 }
 0x1cf   :  { %v369_v23 = vadd.f32 %v965_v30, %v368_v20  ;;  %v782_v24 = vpop.f32.mrb[10].mxu1  ;;  %v443_v31 = vmul.f32 %v974_v50, %v420_v17  ;;  %v467_v38 = vsel %vm454_vm2, %v442_v25, 0.0  ;;  %v1030_v18 = vshrl.u32 %v569_v10, 7  ;;  %p800_p2 = scmp.lt.s32.totalorder %s798_s25, %s794_s24 }
 0x1d0   :  { %v409_v26 = vmul.f32 0.01, %v377_v19  ;;  %v380_v27 = vadd.f32 %v782_v24, %v965_v30  ;;  %v371_v28 = vpop.f32.mrb[11].mxu1  ;;  %474 = vadd.xlane.f32.xlu0 %v473_v21  ;;  %v476_v29 = vsel %vm454_vm2, %v445_v22, 0.0  ;;  %v575_v17 = vadd.s32 4294967288, %v1025_v13 }
 0x1d1   :  { %v407_v32 = vmul.f32 0.01, %v369_v23  ;;  %v372_v33 = vadd.f32 %v965_v30, %v371_v28  ;;  %477 = vadd.xlane.f32.xlu1 %v476_v29  ;;  %v470_v40 = vsel %vm454_vm2, %v443_v31, 0.0  ;;  %v589_v21 = vadd.s32 4294967272, %v1025_v13  ;;  %p801_p3 = por %p800_p2, %p799_p1 }
 0x1d2   :  { %v425_v34 = vmax.f32 %v377_v19, %v409_v26  ;;  %v410_v35 = vmul.f32 0.01, %v380_v27  ;;  %v582_v19 = vadd.s32 4294967280, %v1025_v13  ;;  %v1037_v25 = vadd.s32 4294967248, %v1025_v13 }
 0x1d3   :  { %v423_v36 = vmax.f32 %v369_v23, %v407_v32  ;;  %v408_v37 = vmul.f32 0.01, %v372_v33  ;;  %v1040_v26 = vadd.s32 4294967240, %v1025_v13  ;;  %v578_v28 = vsub.s32 %v575_v17, %v1030_v18  ;;  %p802_p4 = pnand %p801_p3, %p795_p0 }
 0x1d4   :  { %v426_v39 = vmax.f32 %v380_v27, %v410_v35  ;;  %468 = vadd.xlane.f32.xlu0 %v467_v38  ;;  %v448_v41 = vmul.f32 %v974_v50, %v425_v34  ;;  %v585_v31 = vsub.s32 %v582_v19, %v1030_v18  ;;  %v573_v32 = vsub.s32 %v1025_v13, %v1030_v18 }
 0x1d5   :  { %v424_v42 = vmax.f32 %v372_v33, %v408_v37  ;;  %v785_v43 = vpop.f32.mrb[12].mxu1  ;;  %471 = vadd.xlane.f32.xlu1 %v470_v40  ;;  %v446_v51 = vmul.f32 %v974_v50, %v423_v36  ;;  %v592_v34 = vsub.s32 %v589_v21, %v1030_v18  ;;  %v596_v38 = vadd.s32 4294967264, %v1025_v13 }
 0x1d6   :  { %v393_v44 = vadd.f32 %v785_v43, %v965_v30  ;;  %v384_v45 = vpop.f32.mrb[13].mxu1  ;;  %v485_v46 = vsel %vm454_vm2, %v448_v41, 0.0  ;;  %v449_v47 = vmul.f32 %v974_v50, %v426_v39  ;;  %v603_v39 = vadd.s32 4294967256, %v1025_v13 }
 0x1d7   :  { %v385_v48 = vadd.f32 %v965_v30, %v384_v45  ;;  %v786_v49 = vpop.f32.mrb[14].mxu1  ;;  %v447_v56 = vmul.f32 %v974_v50, %v424_v42  ;;  %v479_v63 = vsel %vm454_vm2, %v446_v51, 0.0  ;;  %v613_v41 = vsub.s32 %v1037_v25, %v1030_v18 }
 0x1d8   :  { %v413_v52 = vmul.f32 0.01, %v393_v44  ;;  %v396_v53 = vadd.f32 %v786_v49, %v965_v30  ;;  %v387_v54 = vpop.f32.mrb[15].mxu1  ;;  %486 = vadd.xlane.f32.xlu0 %v485_v46  ;;  %v488_v55 = vsel %vm454_vm2, %v449_v47, 0.0  ;;  %v620_v42 = vsub.s32 %v1040_v26, %v1030_v18 }
 0x1d9   :  { %v411_v57 = vmul.f32 0.01, %v385_v48  ;;  %v388_v58 = vadd.f32 %v965_v30, %v387_v54  ;;  %489 = vadd.xlane.f32.xlu1 %v488_v55  ;;  %v482_v0 = vsel %vm454_vm2, %v447_v56, 0.0  ;;  %v1058_v49 = vadd.s32 4294967208, %v1025_v13 }
 0x1da   :  { %v414_v59 = vmul.f32 0.01, %v396_v53  ;;  %v429_v60 = vmax.f32 %v393_v44, %v413_v52  ;;  %v599_v51 = vsub.s32 %v596_v38, %v1030_v18 }
 0x1db   :  { %v427_v61 = vmax.f32 %v385_v48, %v411_v57  ;;  %v412_v62 = vmul.f32 0.01, %v388_v58  ;;  %v1055_v48 = vadd.s32 4294967216, %v1025_v13 }
 0x1dc   :  { %480 = vadd.xlane.f32.xlu0 %v479_v63  ;;  %v430_v1 = vmax.f32 %v396_v53, %v414_v59  ;;  %v452_v30 = vmul.f32 %v974_v50, %v429_v60  ;;  %v606_v53 = vsub.s32 %v603_v39, %v1030_v18 }
 0x1dd   :  { %v428_v2 = vmax.f32 %v388_v58, %v412_v62  ;;  %483 = vadd.xlane.f32.xlu1 %v482_v0  ;;  %v450_v3 = vmul.f32 %v974_v50, %v427_v61  ;;  %v641_v63 = vsub.s32 %v1055_v48, %v1030_v18 }
 0x1de   :  { %v453_v7 = vmul.f32 %v974_v50, %v430_v1  ;;  %v497_v8 = vsel %vm454_vm2, %v452_v30, 0.0  ;;  %v648_v1 = vsub.s32 %v1058_v49, %v1030_v18 }
 0x1df   :  { %v491_v4 = vsel %vm454_vm2, %v450_v3, 0.0  ;;  %v451_v5 = vmul.f32 %v974_v50, %v428_v2  ;;  %v624_v2 = vadd.s32 4294967232, %v1025_v13 }
 0x1e0   :  { %492 = vadd.xlane.f32.xlu0 %v491_v4  ;;  %v500_v9 = vsel %vm454_vm2, %v453_v7, 0.0 }
 0x1e1   :  { %v494_v6 = vsel %vm454_vm2, %v451_v5, 0.0  ;;  %v627_v17 = vsub.s32 %v624_v2, %v1030_v18 }
 0x1e2   :  { %495 = vadd.xlane.f32.xlu1 %v494_v6 }
 0x1e4   :  { %498 = vadd.xlane.f32.xlu0 %v497_v8 }
 0x1e6   :  { %501 = vadd.xlane.f32.xlu1 %v500_v9 }
 0x254   :  { %v463_v12 = vpop.xlane.xlu1 %462 }
 0x255   :  { %v457_v14 = vpop.xlane.xlu0 %456  ;;  %v507_v50 = vadd.f32 %v1023_v11, %v463_v12 }
 0x256   :  { %v505_v15 = vadd.f32 %v1023_v11, %v457_v14  ;;  %v631_v14 = vadd.s32 4294967224, %v1025_v13 }
 0x257   :  { %v523_v27 = vmul.f32 0.01, %v507_v50 }
 0x258   :  { %v466_v16 = vpop.xlane.xlu1 %465  ;;  %v521_v20 = vmul.f32 0.01, %v505_v15 }
 0x259   :  { %v460_v22 = vpop.xlane.xlu0 %459  ;;  %v508_v24 = vadd.f32 %v1023_v11, %v466_v16  ;;  %v539_v43 = vmax.f32 %v507_v50, %v523_v27 }
 0x25a   :  { %v506_v23 = vadd.f32 %v1023_v11, %v460_v22  ;;  %v537_v33 = vmax.f32 %v505_v15, %v521_v20 }
 0x25b   :  { %v524_v40 = vmul.f32 0.01, %v508_v24  ;;  %v586_v59 = vrot.slane %v539_v43, %v585_v31 }
 0x25c   :  { %v522_v29 = vmul.f32 0.01, %v506_v23  ;;  %v574_v46 = vrot.slane %v537_v33, %v573_v32  ;;  %v634_v33 = vsub.s32 %v631_v14, %v1030_v18 }
 0x25d   :  { %v475_v35 = vpop.xlane.xlu0 %474  ;;  %v540_v55 = vmax.f32 %v508_v24, %v524_v40  ;;  %v659_v24 = vadd.s32 4294967192, %v1025_v13 }
 0x25e   :  { %v538_v36 = vmax.f32 %v506_v23, %v522_v29  ;;  %v478_v37 = vpop.xlane.xlu1 %477  ;;  %v511_v45 = vadd.f32 %v1023_v11, %v475_v35  ;;  %v652_v23 = vadd.s32 4294967200, %v1025_v13 }
 0x25f   :  { %v512_v57 = vadd.f32 %v1023_v11, %v478_v37  ;;  %v593_v6 = vrot.slane %v540_v55, %v592_v34  ;;  %v666_v37 = vadd.s32 4294967184, %v1025_v13 }
 0x260   :  { %v579_v44 = vrot.slane %v538_v36, %v578_v28  ;;  %v527_v60 = vmul.f32 0.01, %v511_v45  ;;  %v655_v40 = vsub.s32 %v652_v23, %v1030_v18 }
 0x261   :  { %v469_v47 = vpop.xlane.xlu0 %468  ;;  %v528_v7 = vmul.f32 0.01, %v512_v57  ;;  %v669_v55 = vsub.s32 %v666_v37, %v1030_v18 }
 0x262   :  { %v509_v52 = vadd.f32 %v1023_v11, %v469_v47  ;;  %v472_v54 = vpop.xlane.xlu1 %471  ;;  %v581_v56 = vsel %vm580_vm3, %v579_v44, %v574_v46  ;;  %v543_v10 = vmax.f32 %v511_v45, %v527_v60  ;;  %v662_v46 = vsub.s32 %v659_v24, %v1030_v18 }
 0x263   :  { %v510_v58 = vadd.f32 %v1023_v11, %v472_v54  ;;  %v588_v3 = vsel %vm587_vm4, %v586_v59, %v581_v56  ;;  %v544_v25 = vmax.f32 %v512_v57, %v528_v7 }
 0x264   :  { %v525_v61 = vmul.f32 0.01, %v509_v52  ;;  %v595_v15 = vsel %vm594_vm5, %v593_v6, %v588_v3  ;;  %v614_v31 = vrot.slane %v543_v10, %v613_v41 }
 0x265   :  { %v526_v62 = vmul.f32 0.01, %v510_v58  ;;  %v487_v0 = vpop.xlane.xlu0 %486  ;;  %v621_v41 = vrot.slane %v544_v25, %v620_v42 }
 0x266   :  { %v541_v4 = vmax.f32 %v509_v52, %v525_v61  ;;  %v515_v5 = vadd.f32 %v1023_v11, %v487_v0  ;;  %v490_v30 = vpop.xlane.xlu1 %489  ;;  %v673_v61 = vadd.s32 4294967176, %v1025_v13 }
 0x267   :  { %v542_v8 = vmax.f32 %v510_v58, %v526_v62  ;;  %v516_v9 = vadd.f32 %v1023_v11, %v490_v30 }
 0x268   :  { %v600_v12 = vrot.slane %v541_v4, %v599_v51  ;;  %v531_v16 = vmul.f32 0.01, %v515_v5 }
 0x269   :  { %v607_v50 = vrot.slane %v542_v8, %v606_v53  ;;  %v481_v19 = vpop.xlane.xlu0 %480  ;;  %v532_v28 = vmul.f32 0.01, %v516_v9 }
 0x26a   :  { %v602_v20 = vsel %vm601_vm6, %v600_v12, %v595_v15  ;;  %v513_v21 = vadd.f32 %v1023_v11, %v481_v19  ;;  %v484_v22 = vpop.xlane.xlu1 %483  ;;  %v547_v34 = vmax.f32 %v515_v5, %v531_v16 }
 0x26b   :  { %v609_v27 = vsel %vm608_vm7, %v607_v50, %v602_v20  ;;  %v514_v29 = vadd.f32 %v1023_v11, %v484_v22  ;;  %v548_v44 = vmax.f32 %v516_v9, %v532_v28 }
 0x26c   :  { %v529_v32 = vmul.f32 0.01, %v513_v21  ;;  %v616_v38 = vsel %vm615_vm8, %v614_v31, %v609_v27  ;;  %v642_v52 = vrot.slane %v547_v34, %v641_v63 }
 0x26d   :  { %v530_v35 = vmul.f32 0.01, %v514_v29  ;;  %v493_v36 = vpop.xlane.xlu0 %492  ;;  %v623_v53 = vsel %vm622_vm9, %v621_v41, %v616_v38  ;;  %v649_v59 = vrot.slane %v548_v44, %v648_v1  ;;  %v676_v1 = vsub.s32 %v673_v61, %v1030_v18 }
 0x26e   :  { %v545_v39 = vmax.f32 %v513_v21, %v529_v32  ;;  %v517_v43 = vadd.f32 %v1023_v11, %v493_v36 }
 0x26f   :  { %v546_v45 = vmax.f32 %v514_v29, %v530_v35  ;;  %v496_v47 = vpop.xlane.xlu1 %495 }
 0x270   :  { %v628_v48 = vrot.slane %v545_v39, %v627_v17  ;;  %v533_v49 = vmul.f32 0.01, %v517_v43  ;;  %v518_v51 = vadd.f32 %v1023_v11, %v496_v47 }
 0x271   :  { %v635_v54 = vrot.slane %v546_v45, %v634_v33  ;;  %v499_v56 = vpop.xlane.xlu0 %498 }
 0x272   :  { %v630_v26 = vsel %vm629_vm10, %v628_v48, %v623_v53  ;;  %v549_v42 = vmax.f32 %v517_v43, %v533_v49  ;;  %v534_v57 = vmul.f32 0.01, %v518_v51  ;;  %v519_v58 = vadd.f32 %v1023_v11, %v499_v56 }
 0x273   :  { %v637_v60 = vsel %vm636_vm11, %v635_v54, %v630_v26  ;;  %v502_v62 = vpop.xlane.xlu1 %501 }
 0x274   :  { %v644_v63 = vsel %vm643_vm12, %v642_v52, %v637_v60  ;;  %v656_v0 = vrot.slane %v549_v42, %v655_v40  ;;  %v550_v2 = vmax.f32 %v518_v51, %v534_v57  ;;  %v535_v3 = vmul.f32 0.01, %v519_v58 }
 0x275   :  { %v520_v4 = vadd.f32 %v1023_v11, %v502_v62  ;;  %v651_v5 = vsel %vm650_vm13, %v649_v59, %v644_v63 }
 0x276   :  { %v663_v30 = vrot.slane %v550_v2, %v662_v46  ;;  %v551_v6 = vmax.f32 %v519_v58, %v535_v3  ;;  %v658_v7 = vsel %vm657_vm14, %v656_v0, %v651_v5 }
 0x277   :  { %v536_v8 = vmul.f32 0.01, %v520_v4 }
 0x278   :  { %v670_v13 = vrot.slane %v551_v6, %v669_v55  ;;  %v665_v9 = vsel %vm664_vm15, %v663_v30, %v658_v7 }
 0x279   :  { %v552_v10 = vmax.f32 %v520_v4, %v536_v8 }
 0x27a   :  { %v672_v12 = vsel %vm671_vm0, %v670_v13, %v665_v9 }
 0x27b   :  { %v677_v14 = vrot.slane %v552_v10, %v676_v1 }
 0x27d   :  { %v679_v11 = vsel %vm678_vm1, %v677_v14, %v672_v12 }
 0x27e   :  { %681 = vst [vmem:[#allocation3] sm:$0x1] %v679_v11 }
 0x27f   :  { %805 = shalt.err (!%p802_p4)
}
 0x280   :  { %s806_s28 = scalar_lea.hbm %s1122_s7, 16 }
 0x281   :  { %p807_p5 = scmp.ne.s32.totalorder %s1122_s7, %s806_s28  ;;  %p810_p6 = scmp.lt.u32.totalorder %s806_s28, %s1122_s7 }
 0x283   :  { %p812_p7 = pnand %p810_p6, %p807_p5 }
 0x285   :  { %815 = shalt.err (!%p812_p7)
}
 0x286   :  { %691 = dma.vmem_to_hbm [thread:$0]  %s689_s23, 16, %s1122_s7, [#allocation4]  }
 0x287   :  { %816 = dma.done.wait [#allocation4], 16  }
 0x288   :  { %817 = vsyncadd [#allocation4], 4294967280 }
 0x289   :  { %695 = vsyncpa [#allocation4], 1 }

</bundles_post_ra>
